<compile_context>
chip_gen: v7x
topology: tpu7x:2x2x1
jax: 0.10.0
libtpu: 0.0.40
codegen_flags: <defaults>
</compile_context>

<pallas_src>
import functools
import math

import jax
import jax.numpy as jnp
from jax import lax
from jax.experimental import pallas as pl
from jax.experimental.pallas import tpu as pltpu

_SQRT_HALF = 0.7071067811865476
_SQRT_2_OVER_PI = 0.7978845608028654


# ---------------------------------------------------------------------------
# Kernel bodies
# ---------------------------------------------------------------------------
def _gelu(h, approx):
    if approx:
        # tanh approximation -> the transcendental rides the EUP slot.
        return 0.5 * h * (1.0 + jnp.tanh(
            jnp.float32(_SQRT_2_OVER_PI) * (h + 0.044715 * h * h * h)))
    # Exact erf GELU (PyTorch nn.GELU() default); multiply by 1/sqrt(2).
    return 0.5 * h * (1.0 + lax.erf(h * jnp.float32(_SQRT_HALF)))


def _layernorm_cm(x, gamma, beta, eps):
    """LayerNorm over channels for channel-major (C, ts) tiles, f32 math."""
    mean = jnp.mean(x, axis=0, keepdims=True)
    centered = x - mean
    var = jnp.mean(centered * centered, axis=0, keepdims=True)
    inv = lax.rsqrt(var + eps)
    return centered * inv * gamma + beta


def _mlp_block_kernel_fused(x_ref, gamma_ref, beta_ref, w1t_ref, b1_ref,
                            w2t_ref, b2_ref, out_ref, *, eps, approx_gelu):
    """nk == 1 fast path.  Grid = (batch, spatial tiles); weights resident.

    x_ref   : (1, C_in, ts)   channel-major input tile (original dtype)
    w1t_ref : (C_hid, C_in)   fc1 weight, (out, in) layout, MXU dtype
    w2t_ref : (C_out, C_hid)  fc2 weight, (out, in) layout, MXU dtype
    gamma/beta/b1/b2: column vectors (C, 1), f32
    """
    x = x_ref[0].astype(jnp.float32)                               # (C_in, ts)
    xn = _layernorm_cm(x, gamma_ref[...].astype(jnp.float32),
                       beta_ref[...].astype(jnp.float32), eps)
    mxu_dtype = w1t_ref.dtype
    # fc1: (C_hid, C_in) @ (C_in, ts) -> (C_hid, ts), f32 accumulation.
    h = jnp.dot(w1t_ref[...], xn.astype(mxu_dtype),
                preferred_element_type=jnp.float32)
    h = _gelu(h + b1_ref[...].astype(jnp.float32), approx_gelu)
    # fc2: (C_out, C_hid) @ (C_hid, ts) -> (C_out, ts).
    y = jnp.dot(w2t_ref[...], h.astype(mxu_dtype),
                preferred_element_type=jnp.float32)
    y = y + b2_ref[...].astype(jnp.float32) + x                    # residual
    out_ref[0] = y.astype(out_ref.dtype)


def _mlp_block_kernel_chunked(x_ref, gamma_ref, beta_ref, w1t_ref, b1_ref,
                              w2t_ref, b2_ref, out_ref, xn_ref, acc_ref,
                              *, eps, approx_gelu):
    """Hidden-dim-chunked path (weights too large for the VMEM budget).

    Grid = (batch, spatial tiles, hidden chunks); hidden is the innermost
    ("arbitrary") axis.  LayerNorm is computed once per tile (k == 0) into an
    MXU-dtype scratch; fc2 partial products accumulate in an f32 scratch.
    """
    k = pl.program_id(2)
    nk = pl.num_programs(2)

    @pl.when(k == 0)
    def _init():
        x = x_ref[0].astype(jnp.float32)
        xn = _layernorm_cm(x, gamma_ref[...].astype(jnp.float32),
                           beta_ref[...].astype(jnp.float32), eps)
        xn_ref[...] = xn.astype(xn_ref.dtype)
        acc_ref[...] = jnp.zeros_like(acc_ref)

    h = jnp.dot(w1t_ref[...], xn_ref[...], preferred_element_type=jnp.float32)
    h = _gelu(h + b1_ref[...].astype(jnp.float32), approx_gelu)
    acc_ref[...] += jnp.dot(w2t_ref[...], h.astype(w2t_ref.dtype),
                            preferred_element_type=jnp.float32)

    @pl.when(k == nk - 1)
    def _finalize():
        y = (acc_ref[...] + b2_ref[...].astype(jnp.float32)
             + x_ref[0].astype(jnp.float32))
        out_ref[0] = y.astype(out_ref.dtype)


# ---------------------------------------------------------------------------
# Tiling / VMEM budgeting
# ---------------------------------------------------------------------------
def _round_up(x, m):
    return ((x + m - 1) // m) * m


def _vmem_budget_bytes():
    """~75% of this generation's VMEM (v7x ~48 MiB, v5e/v6e ~96 MiB)."""
    cap = 64 * 1024 * 1024
    try:
        info = pltpu.get_tpu_info()
        cap = int(getattr(info, "vmem_capacity_bytes", cap)) or cap
    except Exception:
        pass
    return max(32 * 1024 * 1024, (cap * 3) // 4)


def _estimate_vmem_bytes(ts, c_in, c_out, chunk_h, nk, xb, wb):
    """Conservative working-set estimate (includes the GELU intermediate)."""
    ts_p = _round_up(ts, 128)
    ci = _round_up(c_in, 8)
    co = _round_up(c_out, 8)
    ch_s = _round_up(chunk_h, 8)
    ch_l = _round_up(chunk_h, 128)
    ci_l = _round_up(c_in, 128)
    weights = 2 * (ch_s * ci_l + co * ch_l) * wb        # double-buffered weight tiles
    vectors = 2 * (2 * ci + ch_s + co) * 128 * 4        # gamma/beta/b1/b2 (lane-padded)
    io = 2 * ts_p * (ci + co) * xb                      # x / out tiles, double-buffered
    hidden = ts_p * ch_s * (4 + wb)                     # f32 h + MXU-dtype copy of h
    ln = 2 * ts_p * ci * 4                              # f32 x / xn temporaries
    scratch = (ts_p * ci * wb + ts_p * co * 4) if nk > 1 else 0
    return weights + vectors + io + hidden + ln + scratch


def _ts_candidates(hw):
    cands = {t for t in (4096, 2048, 1024, 512, 256, 128) if t <= hw}
    if hw <= 4096:
        cands.add(hw)          # full-extent spatial block is always layout-legal
    return sorted(cands, reverse=True)


def _choose_tiling(b, hw, c_in, c_out, c_hid, xb, wb, budget, force_chunk_h=None):
    """Returns (ts, chunk_h, nk, c_hid_padded)."""
    cands = _ts_candidates(hw)

    def pick_ts(chunk_h, nk):
        fitting = [t for t in cands
                   if _estimate_vmem_bytes(t, c_in, c_out, chunk_h, nk, xb, wb)
                   <= budget]
        if not fitting:
            return None
        # Prefer tiles that give >= 2 parallel grid points (v7x has 2 TCs).
        multi = [t for t in fitting if b * pl.cdiv(hw, t) >= 2]
        return max(multi) if multi else max(fitting)

    if force_chunk_h is None:
        ts = pick_ts(c_hid, 1)
        if ts is not None:
            return ts, c_hid, 1, c_hid        # weights resident, fetched once
        chunk_list = (2048, 1024, 512, 256)   # multiples of 256 (v6e MXU width)
    else:
        chunk_list = (min(force_chunk_h, c_hid),)

    for chunk_h in chunk_list:
        c_hid_p = _round_up(c_hid, chunk_h)
        nk = c_hid_p // chunk_h
        ts = pick_ts(chunk_h, nk)
        if ts is not None:
            return ts, chunk_h, nk, c_hid_p
    chunk_h = chunk_list[-1]
    c_hid_p = _round_up(c_hid, chunk_h)
    return cands[-1], chunk_h, c_hid_p // chunk_h, c_hid_p


# ---------------------------------------------------------------------------
# Wrapper
# ---------------------------------------------------------------------------
def mlp_block_forward(x_nchw, params, *, eps=1e-5, approx_gelu=False,
                      mxu_dtype=jnp.bfloat16, _force_chunk_h=None):
    """MLP_Block.forward.  x_nchw: (B, C_in, H, W) -> (B, C_out, H, W)."""
    gamma, beta, w1, b1, w2, b2 = params
    B, C_in, H, W = x_nchw.shape
    C_hid = w1.shape[1]
    C_out = w2.shape[1]
    assert C_out == C_in, "residual connection requires out_channels == in_channels"
    HW = H * W

    # Free reshape only -- no NCHW<->NHWC HBM round trip anywhere.
    x3 = x_nchw.reshape(B, C_in, HW)

    xb = jnp.dtype(x_nchw.dtype).itemsize
    wb = jnp.dtype(mxu_dtype).itemsize
    budget = _vmem_budget_bytes()
    ts, chunk_h, nk, C_hid_p = _choose_tiling(
        B, HW, C_in, C_out, C_hid, xb, wb, budget, force_chunk_h=_force_chunk_h)

    # Weights pre-transposed once to (out, in) so the kernel stays channel-major.
    w1t = jnp.asarray(w1.T, mxu_dtype)                     # (C_hid, C_in)
    w2t = jnp.asarray(w2.T, mxu_dtype)                     # (C_out, C_hid)
    gammac = gamma.reshape(C_in, 1).astype(jnp.float32)
    betac = beta.reshape(C_in, 1).astype(jnp.float32)
    b1c = b1.reshape(C_hid, 1).astype(jnp.float32)
    b2c = b2.reshape(C_out, 1).astype(jnp.float32)
    if C_hid_p != C_hid:                                   # exact zero-padding
        pad = C_hid_p - C_hid
        w1t = jnp.pad(w1t, ((0, pad), (0, 0)))
        w2t = jnp.pad(w2t, ((0, 0), (0, pad)))
        b1c = jnp.pad(b1c, ((0, pad), (0, 0)))

    n_s = pl.cdiv(HW, ts)   # boundary blocks (ts not dividing HW) are masked by Pallas;
                            # columns are independent so padded lanes never contaminate output.

    if nk == 1:
        kernel = functools.partial(_mlp_block_kernel_fused, eps=eps,
                                   approx_gelu=approx_gelu)
        grid = (B, n_s)
        in_specs = [
            pl.BlockSpec((1, C_in, ts), lambda b, s: (b, 0, s)),      # x tile
            pl.BlockSpec((C_in, 1), lambda b, s: (0, 0)),             # gamma
            pl.BlockSpec((C_in, 1), lambda b, s: (0, 0)),             # beta
            pl.BlockSpec((C_hid_p, C_in), lambda b, s: (0, 0)),       # w1^T (resident)
            pl.BlockSpec((C_hid_p, 1), lambda b, s: (0, 0)),          # b1
            pl.BlockSpec((C_out, C_hid_p), lambda b, s: (0, 0)),      # w2^T (resident)
            pl.BlockSpec((C_out, 1), lambda b, s: (0, 0)),            # b2
        ]
        out_specs = pl.BlockSpec((1, C_out, ts), lambda b, s: (b, 0, s))
        scratch_shapes = []
        dim_sem = ("parallel", "parallel")
    else:
        kernel = functools.partial(_mlp_block_kernel_chunked, eps=eps,
                                   approx_gelu=approx_gelu)
        grid = (B, n_s, nk)
        in_specs = [
            pl.BlockSpec((1, C_in, ts), lambda b, s, k: (b, 0, s)),
            pl.BlockSpec((C_in, 1), lambda b, s, k: (0, 0)),
            pl.BlockSpec((C_in, 1), lambda b, s, k: (0, 0)),
            pl.BlockSpec((chunk_h, C_in), lambda b, s, k: (k, 0)),
            pl.BlockSpec((chunk_h, 1), lambda b, s, k: (k, 0)),
            pl.BlockSpec((C_out, chunk_h), lambda b, s, k: (0, k)),
            pl.BlockSpec((C_out, 1), lambda b, s, k: (0, 0)),
        ]
        out_specs = pl.BlockSpec((1, C_out, ts), lambda b, s, k: (b, 0, s))
        scratch_shapes = [pltpu.VMEM((C_in, ts), mxu_dtype),   # LayerNorm output
                          pltpu.VMEM((C_out, ts), jnp.float32)]  # fc2 accumulator
        dim_sem = ("parallel", "parallel", "arbitrary")

    est = _estimate_vmem_bytes(ts, C_in, C_out, chunk_h, nk, xb, wb)
    vmem_limit = int(min(budget, max(32 * 1024 * 1024, (est * 7) // 4)))

    out3 = pl.pallas_call(
        kernel,
        out_shape=jax.ShapeDtypeStruct((B, C_out, HW), x_nchw.dtype),
        grid_spec=pltpu.PrefetchScalarGridSpec(
            num_scalar_prefetch=0,
            grid=grid,
            in_specs=in_specs,
            out_specs=out_specs,
            scratch_shapes=scratch_shapes,
        ),
        compiler_params=pltpu.CompilerParams(
            dimension_semantics=dim_sem,
            vmem_limit_bytes=vmem_limit,
        ),
    )(x3, gammac, betac, w1t, b1c, w2t, b2c)

    return out3.reshape(B, C_out, H, W)


# ---------------------------------------------------------------------------
# Reference / test
# ---------------------------------------------------------------------------
def init_params(key, in_channels, hidden_channels, out_channels):
    """Deterministic init mimicking nn.LayerNorm / nn.Linear defaults (f32)."""
    k1, k2, k3, k4 = jax.random.split(key, 4)
    gamma = jnp.ones((in_channels,), jnp.float32)
    beta = jnp.zeros((in_channels,), jnp.float32)
    lim1 = 1.0 / math.sqrt(in_channels)
    w1 = jax.random.uniform(k1, (in_channels, hidden_channels), jnp.float32, -lim1, lim1)
    b1 = jax.random.uniform(k2, (hidden_channels,), jnp.float32, -lim1, lim1)
    lim2 = 1.0 / math.sqrt(hidden_channels)
    w2 = jax.random.uniform(k3, (hidden_channels, out_channels), jnp.float32, -lim2, lim2)
    b2 = jax.random.uniform(k4, (out_channels,), jnp.float32, -lim2, lim2)
    return (gamma, beta, w1, b1, w2, b2)


def reference_forward(x_nchw, params, eps=1e-5):
    """Pure-JAX f32 reference of MLP_Block.forward (dropout=0 / eval mode)."""
    gamma, beta, w1, b1, w2, b2 = params
    x = jnp.transpose(x_nchw, (0, 2, 3, 1))
    mean = jnp.mean(x, axis=-1, keepdims=True)
    var = jnp.mean((x - mean) ** 2, axis=-1, keepdims=True)
    xn = (x - mean) / jnp.sqrt(var + eps) * gamma + beta
    h = xn @ w1 + b1
    h = 0.5 * h * (1.0 + lax.erf(h * _SQRT_HALF))
    y = h @ w2 + b2
    y = jnp.transpose(y, (0, 3, 1, 2))
    return y + x_nchw


if __name__ == "__main__":
    key = jax.random.PRNGKey(0)
    kx, kp, kx2, kp2 = jax.random.split(key, 4)

    # --- Config 1: module's own small shapes (fused / weights-resident path).
    B, C, H, W = 2, 4, 16, 16
    HIDDEN = 32
    x = jax.random.normal(kx, (B, C, H, W), jnp.float32)
    params = init_params(kp, in_channels=C, hidden_channels=HIDDEN, out_channels=C)
    out = jax.block_until_ready(mlp_block_forward(x, params))
    ref = reference_forward(x, params)
    assert out.shape == (B, C, H, W)
    # Tolerance loosened vs. the f32 reference: matmul operands are bf16
    # (accumulation f32); LN / GELU / residual are f32.
    assert jnp.allclose(out, ref, atol=5e-2, rtol=5e-2), "mismatch (fused path)"

    # --- Config 2: exercise the hidden-chunked (nk > 1) path explicitly.
    B2, C2, HIDDEN2 = 2, 8, 512
    x2 = jax.random.normal(kx2, (B2, C2, H, W), jnp.float32)
    params2 = init_params(kp2, in_channels=C2, hidden_channels=HIDDEN2, out_channels=C2)
    out2 = jax.block_until_ready(mlp_block_forward(x2, params2, _force_chunk_h=256))
    ref2 = reference_forward(x2, params2)
    assert out2.shape == (B2, C2, H, W)
    assert jnp.allclose(out2, ref2, atol=5e-2, rtol=5e-2), "mismatch (chunked path)"

    print("KERNEL_OK")
</pallas_src>

<mosaic_0001>
module attributes {stable_mosaic.version = 11 : i64} {
  func.func @_mlp_block_kernel_fused(%arg0: i32, %arg1: i32, %arg2: memref<1x4x256xf32, #tpu.memory_space<vmem>>, %arg3: memref<4x1xf32, #tpu.memory_space<vmem>>, %arg4: memref<4x1xf32, #tpu.memory_space<vmem>>, %arg5: memref<32x4xbf16, #tpu.memory_space<vmem>>, %arg6: memref<32x1xf32, #tpu.memory_space<vmem>>, %arg7: memref<4x32xbf16, #tpu.memory_space<vmem>>, %arg8: memref<4x1xf32, #tpu.memory_space<vmem>>, %arg9: memref<1x4x256xf32, #tpu.memory_space<vmem>>) attributes {dimension_semantics = [#tpu.dimension_semantics<parallel>, #tpu.dimension_semantics<parallel>], iteration_bounds = array<i64: 2, 1>, scalar_prefetch = 0 : i64, scratch_operands = 0 : i64, tpu.core_type = #tpu.core_type<tc>, window_params = [{transform_indices = @transform_0, window_bounds = array<i64: 1, 4, 256>}, {pipeline_mode = #tpu.pipeline_mode<synchronous>, transform_indices = @transform_1, window_bounds = array<i64: 4, 1>}, {pipeline_mode = #tpu.pipeline_mode<synchronous>, transform_indices = @transform_2, window_bounds = array<i64: 4, 1>}, {pipeline_mode = #tpu.pipeline_mode<synchronous>, transform_indices = @transform_3, window_bounds = array<i64: 32, 4>}, {pipeline_mode = #tpu.pipeline_mode<synchronous>, transform_indices = @transform_4, window_bounds = array<i64: 32, 1>}, {pipeline_mode = #tpu.pipeline_mode<synchronous>, transform_indices = @transform_5, window_bounds = array<i64: 4, 32>}, {pipeline_mode = #tpu.pipeline_mode<synchronous>, transform_indices = @transform_6, window_bounds = array<i64: 4, 1>}, {transform_indices = @transform_7, window_bounds = array<i64: 1, 4, 256>}]} {
    %c0 = arith.constant 0 : index
    %c0_0 = arith.constant 0 : index
    %c0_1 = arith.constant 0 : index
    %0 = vector.load %arg2[%c0, %c0_0, %c0_1] : memref<1x4x256xf32, #tpu.memory_space<vmem>>, vector<1x4x256xf32>
    %1 = vector.shape_cast %0 : vector<1x4x256xf32> to vector<4x256xf32>
    %c0_2 = arith.constant 0 : index
    %c0_3 = arith.constant 0 : index
    %2 = vector.load %arg3[%c0_2, %c0_3] : memref<4x1xf32, #tpu.memory_space<vmem>>, vector<4x1xf32>
    %c0_4 = arith.constant 0 : index
    %c0_5 = arith.constant 0 : index
    %3 = vector.load %arg4[%c0_4, %c0_5] : memref<4x1xf32, #tpu.memory_space<vmem>>, vector<4x1xf32>
    %cst = arith.constant dense<0.000000e+00> : vector<256xf32>
    %4 = vector.multi_reduction <add>, %1, %cst [0] : vector<4x256xf32> to vector<256xf32>
    %5 = vector.shape_cast %4 : vector<256xf32> to vector<1x256xf32>
    %cst_6 = arith.constant 4.000000e+00 : f32
    %6 = vector.broadcast %cst_6 : f32 to vector<1x256xf32>
    %7 = arith.divf %5, %6 : vector<1x256xf32>
    %8 = vector.broadcast %7 : vector<1x256xf32> to vector<4x256xf32>
    %9 = arith.subf %1, %8 : vector<4x256xf32>
    %10 = arith.mulf %9, %9 : vector<4x256xf32>
    %cst_7 = arith.constant dense<0.000000e+00> : vector<256xf32>
    %11 = vector.multi_reduction <add>, %10, %cst_7 [0] : vector<4x256xf32> to vector<256xf32>
    %12 = vector.shape_cast %11 : vector<256xf32> to vector<1x256xf32>
    %cst_8 = arith.constant 4.000000e+00 : f32
    %13 = vector.broadcast %cst_8 : f32 to vector<1x256xf32>
    %14 = arith.divf %12, %13 : vector<1x256xf32>
    %cst_9 = arith.constant 9.99999974E-6 : f32
    %15 = vector.broadcast %cst_9 : f32 to vector<1x256xf32>
    %16 = arith.addf %14, %15 : vector<1x256xf32>
    %17 = math.rsqrt %16 : vector<1x256xf32>
    %18 = vector.broadcast %17 : vector<1x256xf32> to vector<4x256xf32>
    %19 = arith.mulf %9, %18 : vector<4x256xf32>
    %20 = vector.broadcast %2 : vector<4x1xf32> to vector<4x256xf32>
    %21 = arith.mulf %19, %20 : vector<4x256xf32>
    %22 = vector.broadcast %3 : vector<4x1xf32> to vector<4x256xf32>
    %23 = arith.addf %21, %22 : vector<4x256xf32>
    %c0_10 = arith.constant 0 : index
    %c0_11 = arith.constant 0 : index
    %24 = vector.load %arg5[%c0_10, %c0_11] : memref<32x4xbf16, #tpu.memory_space<vmem>>, vector<32x4xbf16>
    %25 = arith.truncf %23 : vector<4x256xf32> to vector<4x256xbf16>
    %cst_12 = arith.constant dense<0.000000e+00> : vector<32x256xf32>
    %26 = tpu.matmul %24, %25, %cst_12 {dimension_numbers = #tpu.dot_dimension_numbers<[1], [0], [0], [1], [0, 0, 1, 1], [], []>} : vector<32x4xbf16>, vector<4x256xbf16>, vector<32x256xf32> -> vector<32x256xf32>
    %c0_13 = arith.constant 0 : index
    %c0_14 = arith.constant 0 : index
    %27 = vector.load %arg6[%c0_13, %c0_14] : memref<32x1xf32, #tpu.memory_space<vmem>>, vector<32x1xf32>
    %28 = vector.broadcast %27 : vector<32x1xf32> to vector<32x256xf32>
    %29 = arith.addf %26, %28 : vector<32x256xf32>
    %cst_15 = arith.constant 5.000000e-01 : f32
    %30 = vector.broadcast %cst_15 : f32 to vector<32x256xf32>
    %31 = arith.mulf %30, %29 : vector<32x256xf32>
    %cst_16 = arith.constant 0.707106769 : f32
    %32 = vector.broadcast %cst_16 : f32 to vector<32x256xf32>
    %33 = arith.mulf %29, %32 : vector<32x256xf32>
    %34 = math.erf %33 : vector<32x256xf32>
    %cst_17 = arith.constant 1.000000e+00 : f32
    %35 = vector.broadcast %cst_17 : f32 to vector<32x256xf32>
    %36 = arith.addf %35, %34 : vector<32x256xf32>
    %37 = arith.mulf %31, %36 : vector<32x256xf32>
    %c0_18 = arith.constant 0 : index
    %c0_19 = arith.constant 0 : index
    %38 = vector.load %arg7[%c0_18, %c0_19] : memref<4x32xbf16, #tpu.memory_space<vmem>>, vector<4x32xbf16>
    %39 = arith.truncf %37 : vector<32x256xf32> to vector<32x256xbf16>
    %cst_20 = arith.constant dense<0.000000e+00> : vector<4x256xf32>
    %40 = tpu.matmul %38, %39, %cst_20 {dimension_numbers = #tpu.dot_dimension_numbers<[1], [0], [0], [1], [0, 0, 1, 1], [], []>} : vector<4x32xbf16>, vector<32x256xbf16>, vector<4x256xf32> -> vector<4x256xf32>
    %c0_21 = arith.constant 0 : index
    %c0_22 = arith.constant 0 : index
    %41 = vector.load %arg8[%c0_21, %c0_22] : memref<4x1xf32, #tpu.memory_space<vmem>>, vector<4x1xf32>
    %42 = vector.broadcast %41 : vector<4x1xf32> to vector<4x256xf32>
    %43 = arith.addf %40, %42 : vector<4x256xf32>
    %44 = arith.addf %43, %1 : vector<4x256xf32>
    %c0_23 = arith.constant 0 : index
    %c0_24 = arith.constant 0 : index
    %c0_25 = arith.constant 0 : index
    %45 = vector.load %arg9[%c0_23, %c0_24, %c0_25] : memref<1x4x256xf32, #tpu.memory_space<vmem>>, vector<1x4x256xf32>
    %46 = vector.shape_cast %45 : vector<1x4x256xf32> to vector<4x256xf32>
    %47 = vector.shape_cast %44 : vector<4x256xf32> to vector<1x4x256xf32>
    tpu.vector_store %arg9[%c0_23, %c0_24, %c0_25], %47 {strides = array<i32>} : memref<1x4x256xf32, #tpu.memory_space<vmem>>, vector<1x4x256xf32>,
    return
  }
  func.func @transform_0(%arg0: i32, %arg1: i32) -> (i32, i32, i32) {
    %c0_i32 = arith.constant 0 : i32
    %c0_i32_0 = arith.constant 0 : i32
    return %arg0, %c0_i32, %arg1 : i32, i32, i32
  }
  func.func @transform_1(%arg0: i32, %arg1: i32) -> (i32, i32) {
    %c0_i32 = arith.constant 0 : i32
    %c0_i32_0 = arith.constant 0 : i32
    %c0_i32_1 = arith.constant 0 : i32
    return %c0_i32, %c0_i32_0 : i32, i32
  }
  func.func @transform_2(%arg0: i32, %arg1: i32) -> (i32, i32) {
    %c0_i32 = arith.constant 0 : i32
    %c0_i32_0 = arith.constant 0 : i32
    %c0_i32_1 = arith.constant 0 : i32
    return %c0_i32, %c0_i32_0 : i32, i32
  }
  func.func @transform_3(%arg0: i32, %arg1: i32) -> (i32, i32) {
    %c0_i32 = arith.constant 0 : i32
    %c0_i32_0 = arith.constant 0 : i32
    %c0_i32_1 = arith.constant 0 : i32
    return %c0_i32, %c0_i32_0 : i32, i32
  }
  func.func @transform_4(%arg0: i32, %arg1: i32) -> (i32, i32) {
    %c0_i32 = arith.constant 0 : i32
    %c0_i32_0 = arith.constant 0 : i32
    %c0_i32_1 = arith.constant 0 : i32
    return %c0_i32, %c0_i32_0 : i32, i32
  }
  func.func @transform_5(%arg0: i32, %arg1: i32) -> (i32, i32) {
    %c0_i32 = arith.constant 0 : i32
    %c0_i32_0 = arith.constant 0 : i32
    %c0_i32_1 = arith.constant 0 : i32
    return %c0_i32, %c0_i32_0 : i32, i32
  }
  func.func @transform_6(%arg0: i32, %arg1: i32) -> (i32, i32) {
    %c0_i32 = arith.constant 0 : i32
    %c0_i32_0 = arith.constant 0 : i32
    %c0_i32_1 = arith.constant 0 : i32
    return %c0_i32, %c0_i32_0 : i32, i32
  }
  func.func @transform_7(%arg0: i32, %arg1: i32) -> (i32, i32, i32) {
    %c0_i32 = arith.constant 0 : i32
    %c0_i32_0 = arith.constant 0 : i32
    return %arg0, %c0_i32, %arg1 : i32, i32, i32
  }
}

</mosaic_0001>

<bundles_post_ra>
// kernel: tpu_custom_call.1
= control target key start
LH: loop header
LB: loop body
LE: loop exit
PB: predicated region body
PF: predicated region fallthrough
CT: control target
= control target key end

     0   :  { %12 = vsyncpa [#allocation3], 0  ;;  %s1087_s0 = inlined_call_operand.vmem [shape: f32[2,4,256], index: 0, kind: input, shape index: {}]   ;;  %s1088_s1 = inlined_call_operand.vmem [shape: f32[4,1], index: 1, kind: input, shape index: {}]   ;;  %s1089_s2 = inlined_call_operand.vmem [shape: f32[4,1], index: 2, kind: input, shape index: {}]   ;;  %s1090_s3 = inlined_call_operand.vmem [shape: bf16[32,4], index: 3, kind: input, shape index: {}]   ;;  %s1091_s4 = inlined_call_operand.vmem [shape: f32[32,1], index: 4, kind: input, shape index: {}]   ;;  %s1092_s5 = inlined_call_operand.vmem [shape: bf16[4,32], index: 5, kind: input, shape index: {}]   ;;  %s1093_s6 = inlined_call_operand.vmem [shape: f32[4,1], index: 6, kind: input, shape index: {}]   ;;  %s1094_s7 = inlined_call_operand.hbm [shape: f32[2,4,256], index: 7, kind: output, shape index: {}]  }
   0x1   :  { %14 = vsyncpa [#allocation3 + $0x1], 0  ;;  %s925_s24 = smov 0   ;;  %s927_s25 = smov 0  }
   0x2   :  { %s929_s26 = smov 0   ;;  %s931_s27 = smov 0  }
   0x3   :  { %s933_s28 = smov 0   ;;  %s935_s29 = smov 0  }
   0x4 LB: > { %s699_s30 = sadd.s32 4294967295, %s880_s29   ;;  %s700_s8 = sadd.s32 4294967294, %s880_s29   ;;  %s880_s29 = sphi %s935_s29, %s20_s29   ;;  %s876_s28 = sphi %s933_s28, %s1101_s28   ;;  %s872_s27 = sphi %s931_s27, %s1100_s27   ;;  %s868_s26 = sphi %s929_s26, %s1099_s26   ;;  %s864_s25 = sphi %s927_s25, %s1098_s25   ;;  %s860_s24 = sphi %s925_s24, %s1097_s24  }
   0x5   : > { %s32_s9 = sadd.s32 1, %s876_s28  ;;  %s195_s10 = sadd.s32 1, %s868_s26 }
   0x6   : > { %p34_p0 = scmp.ge.s32.totalorder %s32_s9, 2  ;;  %p205_p1 = scmp.ne.s32.totalorder %s868_s26, %s864_s25 }
   0x7   : > { %p206_p2 = scmp.eq.s32.totalorder %s699_s30, 1  ;;  %p211_p3 = scmp.ne.s32.totalorder %s864_s25, %s860_s24 }
   0x8   : > { %s1103_s9 = smov (%p34_p0, %s32_s9), 0  ;;  %p212_p5 = scmp.eq.s32.totalorder %s700_s8, 1 }
   0x9   : > { %p965_p4 = por %p206_p2, %p205_p1  ;;  %s190_s12 = ssub.s32 %s876_s28, %s1103_s9 }
   0xa   : > { %p703_p6 = scmp.ge.s32.totalorder %s880_s29, 1  ;;  %p193_p7 = scmp.eq.s32.totalorder %s190_s12, 0 }
   0xb   : > { %p972_p8 = por %p212_p5, %p211_p3  ;;  %p261_p9 = scmp.lt.s32.totalorder %s880_s29, 3 }
   0xc   : > { %s978_s14 = scalar_select %p193_p7, %s868_s26, %s195_s10  }
   0xd   : > { %p262_p10 = pnand %p703_p6, %p261_p9 }
   0xe   : > { %v310_v0 = vld [vmem:[%s1088_s1] sm:$0xf] (!%p262_p10)  ;;  %v882_v1 = vmov (!%p262_p10), 0   ;;  %v404_v3 = vld [vmem:[%s1091_s4 + $0x10] sm:$0xff] (!%p262_p10)  ;;  %p298_p11 = scmp.lt.s32.totalorder (!%p262_p10), %s872_s27, 1  ;;  %vm315_vm0 = vcmask (!%p262_p10), 1043456   ;;  %v374_v50 = vlaneseq (!%p262_p10) }
   0xf   : > { %265 = sbr.rel (%p262_p10) target bundleno = 641 (0x281), region = 48  ;;  %777 = vset.pattern.permute.xlu0 (!%p262_p10), %v882_v1  ;;  %482 = vmatprep.mubr.bf16.mxu0 (!%p262_p10), %v882_v1  ;;  %v311_v2 = vld [vmem:[%s1089_s2] sm:$0xf] (!%p262_p10)  ;;  %v403_v8 = vld [vmem:[%s1091_s4 + $0x8] sm:$0xff] (!%p262_p10)  ;;  %v405_v11 = vld [vmem:[%s1091_s4 + $0x18] sm:$0xff] (!%p262_p10)  ;;  %vm443_vm1 = vcmask (!%p262_p10), 1041408  }
  0x10   : > { %369 = vperm.xlu0 (!%p262_p10), %777, %v310_v0   ;;  %778 = vset.pattern.permute.xlu1 (!%p262_p10), %v882_v1  ;;  %v548_v4 = vld [vmem:[%s1093_s6] sm:$0xf] (!%p262_p10)  ;;  %v883_v48 = vmov (!%p262_p10), 839922192   ;;  %v375_v53 = vshrl.u32 (!%p262_p10), %v374_v50, 7  ;;  %vm436_vm2 = vcmask (!%p262_p10), 31744  }
  0x11   : > { %590 = vmatprep.mubr.bf16.mxu1 (!%p262_p10), %v882_v1  ;;  %v402_v6 = vld [vmem:[%s1091_s4] sm:$0xff] (!%p262_p10)  ;;  %v372_v49 = vunpack.c.l.s4 (!%p262_p10), %v883_v48  ;;  %vm554_vm3 = vcmask (!%p262_p10), 261120   ;;  %s719_s16 = sshll.u32 (!%p262_p10), %s872_s27, 7 }
  0x12   : > { %408 = vperm.xlu1 (!%p262_p10), %778, %v402_v6   ;;  %v780_v6 = vld [vmem:[%s1090_s3] sm:$0xff] (!%p262_p10)   ;;  %s1040_s21 = scalar_lea.hbm (!%p262_p10), %s1094_s7, %s719_s16 }
  0x13   : > { %v373_v52 = vunpack.c.0.s8 (!%p262_p10), %v372_v49 }
  0x14   : > { %382 = vperm.xlu0 (!%p262_p10), %777, %v311_v2  }
  0x15   : > { %v376_v55 = vsub.s32 (!%p262_p10), %v373_v52, %v375_v53 }
  0x16   : > { %s299_s23 = scalar_select %p298_p11, %s872_s27, 1  ;;  %413 = vperm.xlu1 %778, %v403_v8   ;;  %v781_v8 = vld [vmem:[%s1090_s3 + $0x8] sm:$0xff]  }
  0x17   : > { %s884_s27 = smov [#allocation2]  }
  0x18   : > { %418 = vperm.xlu0 %777, %v404_v3   ;;  %s718_s30 = sshll.u32 %s299_s23, 3 }
  0x19   : > { %s305_s12 = scalar_lea.vmem %s1087_s0, %s718_s30  ;;  %s806_s30 = sshll.u32 %s884_s27, 4  ;;  %s807_s30 = int_to_ptr.vmem [resolvable:$false] %s806_s30 }
  0x1a   : > { %v1001_v5 = vld [vmem:[%s305_s12] sm:$0xff]  ;;  %423 = vperm.xlu1 %778, %v405_v11   ;;  %s294_s12 = sand.u32 1, %s864_s25   ;;  %s808_s8 = scalar_lea.vmem %s807_s30, 256 }
  0x1b   : > { %v1008_v7 = vcombine.high %v1001_v5, %v1001_v5  ;;  %v316_v9 = vsel %vm315_vm0, %v1001_v5, 0.0  ;;  %s704_s15 = sshll.u32 %s294_s12, 3  ;;  %s607_s22 = scalar_lea.sflag [#allocation3], %s294_s12 }
  0x1c   : > { %551 = vperm.xlu0 %777, %v548_v4   ;;  %v317_v12 = vrot.slane %v316_v9, 4  ;;  %s296_s17 = scalar_lea.vmem [#allocation2], %s704_s15 }
  0x1d   : > { %v323_v10 = vsel %vm315_vm0, %v1008_v7, 0.0  ;;  %s623_s18 = sshll.u32 %s296_s17, 4  ;;  %s1042_s18 = int_to_ptr.vmem [resolvable:$true] %s623_s18 }
  0x1e   : > { %v324_v13 = vrot.slane %v323_v10, 4  ;;  %v318_v14 = vadd.f32 %v317_v12, %v316_v9  ;;  %s802_s23 = scalar_lea.vmem %s1042_s18, 128  ;;  %p809_p1 = scmp.lt.s32.totalorder %s1042_s18, %s807_s30 }
  0x1f   : > { %p803_p12 = scmp.ne.s32.totalorder %s1042_s18, %s802_s23  ;;  %p810_p2 = scmp.lt.s32.totalorder %s808_s8, %s802_s23 }
  0x20   : > { %v325_v15 = vadd.f32 %v324_v13, %v323_v10  ;;  %v319_v16 = vrot.slane %v318_v14, 2 }
  0x21   : > { %p804_p13 = pnand %p803_p12, %p965_p4  ;;  %p811_p3 = por %p810_p2, %p809_p1 }
  0x22   : > { %v326_v17 = vrot.slane %v325_v15, 2  ;;  %v320_v18 = vadd.f32 %v319_v16, %v318_v14 }
  0x23   : > { %p805_p0 = pneg %p804_p13 }
  0x24   : > { %v327_v19 = vadd.f32 %v326_v17, %v325_v15  ;;  %v321_v20 = vrot.slane %v320_v18, 1 }
  0x25   : > { %p812_p5 = pnand %p811_p3, %p805_p0 }
  0x26   : > { %v328_v21 = vrot.slane %v327_v19, 1  ;;  %v322_v22 = vadd.f32 %v321_v20, %v320_v18 }
  0x28   : > { %v329_v23 = vadd.f32 %v328_v21, %v327_v19  ;;  %v331_v24 = vmul.f32 0.25, %v322_v22 }
  0x2a   : > { %v332_v25 = vmul.f32 0.25, %v329_v23 }
  0x2c   : > { %v335_v26 = vcombine.low %v331_v24, %v332_v25 }
  0x2e   : > { %v337_v27 = vsub.f32 %v1001_v5, %v335_v26 }
  0x30   : > { %v338_v28 = vmul.f32 %v337_v27, %v337_v27 }
  0x32   : > { %v340_v29 = vcombine.high %v338_v28, %v338_v28  ;;  %v342_v30 = vsel %vm315_vm0, %v338_v28, 0.0 }
  0x33   : > { %v343_v32 = vrot.slane %v342_v30, 4 }
  0x34   : > { %v349_v31 = vsel %vm315_vm0, %v340_v29, 0.0 }
  0x35   : > { %v350_v33 = vrot.slane %v349_v31, 4  ;;  %v344_v34 = vadd.f32 %v343_v32, %v342_v30 }
  0x37   : > { %v351_v35 = vadd.f32 %v350_v33, %v349_v31  ;;  %v345_v36 = vrot.slane %v344_v34, 2 }
  0x39   : > { %v352_v37 = vrot.slane %v351_v35, 2  ;;  %v346_v38 = vadd.f32 %v345_v36, %v344_v34 }
  0x3b   : > { %v353_v39 = vadd.f32 %v352_v37, %v351_v35  ;;  %v347_v40 = vrot.slane %v346_v38, 1 }
  0x3d   : > { %v354_v41 = vrot.slane %v353_v39, 1  ;;  %v348_v42 = vadd.f32 %v347_v40, %v346_v38 }
  0x3f   : > { %v355_v43 = vadd.f32 %v354_v41, %v353_v39  ;;  %v356_v44 = vmul.f32 0.25, %v348_v42 }
  0x41   : > { %v357_v45 = vmul.f32 0.25, %v355_v43  ;;  %v358_v46 = vadd.f32 1e-05, %v356_v44 }
  0x43   : > { %v359_v47 = vadd.f32 1e-05, %v357_v45  ;;  %782 = vrsqrt.f32 %v358_v46 }
  0x45   : > { %784 = vrsqrt.f32 %v359_v47 }
  0x4d   : > { %v783_v51 = vpop.eup %782 }
  0x4f   : > { %v785_v54 = vpop.eup %784 }
  0x50   : > { %v364_v56 = vcombine.low %v783_v51, %v785_v54 }
  0x52   : > { %v366_v58 = vmul.f32 %v364_v56, %v337_v27 }
  0x8f   : > { %v370_v57 = vpop.permute.xlu0 %369 }
  0x90   : > { %v377_v59 = vrot.slane %v370_v57, %v376_v55 }
  0x91   : > { %v409_v9 = vpop.permute.xlu1 %408 }
  0x92   : > { %v379_v61 = vmul.f32 %v377_v59, %v366_v58 }
  0x93   : > { %v383_v60 = vpop.permute.xlu0 %382 }
  0x94   : > { %v390_v62 = vrot.slane %v383_v60, %v376_v55 }
  0x95   : > { %v414_v13 = vpop.permute.xlu1 %413 }
  0x96   : > { %v392_v63 = vadd.f32 %v390_v62, %v379_v61 }
  0x97   : > { %v419_v22 = vpop.permute.xlu0 %418 }
  0x98   : > { %v398_v0 = vcombine.high %v392_v63, %v392_v63  ;;  %v400_v2 = vpack.c.bf16 %v392_v63, %v392_v63 }
  0x99   : > { %v424_v26 = vpop.permute.xlu1 %423 }
  0x9a   : > { %v401_v3 = vpack.c.bf16 %v398_v0, %v398_v0  ;;  %v445_v4 = vsel %vm443_vm1, %v400_v2, 0 }
  0x9c   : > { %709 = vmatprep.subr.msk.bf16.mxu0 %vm443_vm1, %v401_v3 }
  0x9d   : > { %451 = vmatpush1.bf16.msra.mxu0 %v445_v4 }
  0xa0   : > { %710 = vmatmul.mubr.msk.bf16.vlgmr.msra.gmra.mrb[0].mxu0 %vm436_vm2, %v780_v6 }
  0xa1   : > { %492 = vmatprep.mubr.bf16.mxu0 %v882_v1 }
  0xa8   : > { %711 = vmatmul.mubr.msk.bf16.gmra.mrb[4].mxu0 %vm436_vm2, %v781_v8 }
 0x173   : > { %v484_v10 = vpop.f32.mrb[0].mxu0 }
 0x174   : > { %v485_v11 = vadd.f32 %v484_v10, %v409_v9  ;;  %v486_v12 = vpop.f32.mrb[1].mxu0 }
 0x175   : > { %v487_v14 = vadd.f32 %v486_v12, %v409_v9  ;;  %v488_v15 = vpop.f32.mrb[2].mxu0  ;;  %v552_v12 = vpop.permute.xlu0 %551 }
 0x176   : > { %v511_v16 = vmul.f32 0.70710677, %v485_v11  ;;  %v489_v17 = vadd.f32 %v488_v15, %v414_v13  ;;  %v490_v18 = vpop.f32.mrb[3].mxu0  ;;  %v503_v42 = vmul.f32 0.5, %v485_v11  ;;  %v543_v11 = vld [vmem:[%s1092_s5] sm:$0x3] }
 0x177   : > { %v512_v19 = vmul.f32 0.70710677, %v487_v14  ;;  %v491_v20 = vadd.f32 %v490_v18, %v414_v13  ;;  %v504_v45 = vmul.f32 0.5, %v487_v14 }
 0x178   : > { %786 = verf.f32 %v511_v16  ;;  %v513_v21 = vmul.f32 0.70710677, %v489_v17  ;;  %v505_v43 = vmul.f32 0.5, %v489_v17 }
 0x179   : > { %788 = verf.f32 %v512_v19  ;;  %v514_v1 = vmul.f32 0.70710677, %v491_v20  ;;  %v506_v46 = vmul.f32 0.5, %v491_v20 }
 0x17a   : > { %790 = verf.f32 %v513_v21 }
 0x17b   : > { %792 = verf.f32 %v514_v1  ;;  %v494_v23 = vpop.f32.mrb[4].mxu0 }
 0x17c   : > { %v495_v24 = vadd.f32 %v494_v23, %v419_v22  ;;  %v496_v25 = vpop.f32.mrb[5].mxu0 }
 0x17d   : > { %v497_v27 = vadd.f32 %v496_v25, %v419_v22  ;;  %v498_v28 = vpop.f32.mrb[6].mxu0 }
 0x17e   : > { %v515_v29 = vmul.f32 0.70710677, %v495_v24  ;;  %v499_v30 = vadd.f32 %v498_v28, %v424_v26  ;;  %v500_v31 = vpop.f32.mrb[7].mxu0  ;;  %v507_v60 = vmul.f32 0.5, %v495_v24 }
 0x17f   : > { %v516_v32 = vmul.f32 0.70710677, %v497_v27  ;;  %v501_v33 = vadd.f32 %v500_v31, %v424_v26  ;;  %v508_v63 = vmul.f32 0.5, %v497_v27 }
 0x180   : > { %794 = verf.f32 %v515_v29  ;;  %v517_v34 = vmul.f32 0.70710677, %v499_v30  ;;  %v509_v61 = vmul.f32 0.5, %v499_v30 }
 0x181   : > { %796 = verf.f32 %v516_v32  ;;  %v518_v35 = vmul.f32 0.70710677, %v501_v33  ;;  %v510_v0 = vmul.f32 0.5, %v501_v33 }
 0x182   : > { %v787_v36 = vpop.eup %786  ;;  %798 = verf.f32 %v517_v34 }
 0x183   : > { %v789_v37 = vpop.eup %788  ;;  %800 = verf.f32 %v518_v35  ;;  %v527_v38 = vadd.f32 1.0, %v787_v36 }
 0x184   : > { %v791_v39 = vpop.eup %790  ;;  %v528_v40 = vadd.f32 1.0, %v789_v37 }
 0x185   : > { %v793_v41 = vpop.eup %792  ;;  %v529_v44 = vadd.f32 1.0, %v791_v39  ;;  %v535_v48 = vmul.f32 %v527_v38, %v503_v42 }
 0x186   : > { %v530_v47 = vadd.f32 1.0, %v793_v41  ;;  %v536_v50 = vmul.f32 %v528_v40, %v504_v45 }
 0x187   : > { %v537_v49 = vmul.f32 %v529_v44, %v505_v43 }
 0x188   : > { %v538_v51 = vmul.f32 %v530_v47, %v506_v46 }
 0x189   : > { %v544_v52 = vpack.c.bf16 %v537_v49, %v535_v48 }
 0x18a   : > { %v795_v53 = vpop.eup %794  ;;  %v545_v54 = vpack.c.bf16 %v538_v51, %v536_v50 }
 0x18b   : > { %v797_v55 = vpop.eup %796  ;;  %v531_v56 = vadd.f32 1.0, %v795_v53 }
 0x18c   : > { %v799_v57 = vpop.eup %798  ;;  %v532_v58 = vadd.f32 1.0, %v797_v55  ;;  %558 = vmatprep.subr.bf16.mxu1 %v545_v54 }
 0x18d   : > { %v801_v59 = vpop.eup %800  ;;  %v533_v62 = vadd.f32 1.0, %v799_v57  ;;  %559 = vmatpush1.bf16.msra.mxu1 %v544_v52  ;;  %v539_v3 = vmul.f32 %v531_v56, %v507_v60 }
 0x18e   : > { %v534_v2 = vadd.f32 1.0, %v801_v59  ;;  %v540_v6 = vmul.f32 %v532_v58, %v508_v63 }
 0x18f   : > { %v541_v4 = vmul.f32 %v533_v62, %v509_v61 }
 0x190   : > { %v542_v8 = vmul.f32 %v534_v2, %v510_v0 }
 0x191   : > { %v546_v9 = vpack.c.bf16 %v541_v4, %v539_v3 }
 0x192   : > { %v547_v10 = vpack.c.bf16 %v542_v8, %v540_v6 }
 0x194   : > { %560 = vmatprep.subr.bf16.mxu1 %v547_v10 }
 0x195   : > { %561 = vmatpush1.bf16.msra.mxu1 %v546_v9 }
 0x198   : > { %712 = vmatmul.mubr.msk.bf16.vlgmr.msra.gmra.mrb[0].mxu1 %vm554_vm3, %v543_v11 }
 0x26b   : > { %v592_v13 = vpop.f32.mrb[0].mxu1 }
 0x26c   : > { %v593_v14 = vadd.f32 %v592_v13, %v552_v12  ;;  %v594_v15 = vpop.f32.mrb[1].mxu1 }
 0x26d   : > { %v595_v16 = vadd.f32 %v594_v15, %v552_v12  ;;  %v596_v17 = vpop.f32.mrb[2].mxu1 }
 0x26e   : > { %v599_v18 = vadd.f32 %v593_v14, %v1001_v5  ;;  %v597_v19 = vpop.f32.mrb[3].mxu1 }
 0x26f   : > { %v600_v20 = vadd.f32 %v595_v16, %v1008_v7 }
 0x271   : > { %v603_v21 = vcombine.low %v599_v18, %v600_v20 }
 0x273   : > { %605 = vst [vmem:[%s296_s17] sm:$0xff] %v603_v21 }
 0x274   : > { %815 = shalt.err (!%p812_p5)
}
 0x275   : > { %s816_s10 = scalar_lea.hbm %s1040_s21, 128  ;;  %s820_s16 = scalar_lea.hbm %s1094_s7, 256 }
 0x276   : > { %p817_p6 = scmp.ne.s32.totalorder %s1040_s21, %s816_s10  ;;  %p821_p10 = scmp.lt.u32.totalorder %s1040_s21, %s1094_s7 }
 0x277   : > { %p822_p11 = scmp.lt.u32.totalorder %s820_s16, %s816_s10  ;;  %p824_p13 = scmp.lt.u32.totalorder %s816_s10, %s1040_s21 }
 0x278   : > { %p818_p7 = pnand %p817_p6, %p965_p4 }
 0x279   : > { %p823_p12 = por %p822_p11, %p821_p10 }
 0x27a   : > { %p819_p9 = pneg %p818_p7 }
 0x27b   : > { %p825_p0 = por %p824_p13, %p823_p12 }
 0x27d   : > { %p826_p1 = pnand %p825_p0, %p819_p9 }
 0x27f   : > { %829 = shalt.err (!%p826_p1)
}
 0x280   : > { %720 = dma.vmem_to_hbm [thread:$0]  (%p965_p4), %s1042_s18, 128, %s1040_s21, %s607_s22  }
 0x281 PF: > { %p726_p2 = scmp.ge.s32.totalorder %s880_s29, 2  ;;  %s635_s20 = sand.u32 1, %s860_s24  }
 0x282   : > { %s636_s23 = scalar_lea.sflag [#allocation3], %s635_s20 }
 0x283   : > { %p723_p3 = pnand %p726_p2, %p972_p8 }
 0x285   : > { %855 = dma.done.wait (!%p723_p3), %s636_s23, 128  }
 0x286   : > { %857 = vsyncadd (!%p723_p3), %s636_s23, 4294967168  ;;  %s20_s29 = sadd.s32 1, %s880_s29   ;;  %s1097_s24 = smov %s864_s25 }
 0x287   : > { %p17_p5 = scmp.ge.s32.totalorder %s20_s29, 4   ;;  %s1098_s25 = smov %s868_s26 }
 0x288   : > { %s1099_s26 = smov %s978_s14  ;;  %s1100_s27 = smov %s876_s28 }
 0x289   : > { %s1101_s28 = smov %s1103_s9  ;;  %19 = sbr.rel (!%p17_p5) target bundleno = 4 (0x4), region = 83 }
 0x290   :  { %641 = vsyncpa [#allocation3], 1 }
 0x291   :  { %643 = vsyncpa [#allocation3 + $0x1], 1 }

</bundles_post_ra>
